<compile_context>
chip_gen: v7x
topology: tpu7x:2x2x1
jax: 0.10.0
libtpu: 0.0.40
codegen_flags: <defaults>
</compile_context>

<pallas_src>
import functools

import jax
import jax.numpy as jnp
from jax.experimental import pallas as pl
from jax.experimental.pallas import tpu as pltpu

D_IN, D_H, D_OUT = 5, 64, 1
D_IN_PAD = 8  # K padded to 8: rows 0-4 = features, row 5 = 1.0 (bias), 6-7 = 0


def _mlp_kernel(x_ref, w1_ref, w2_ref, b2_ref, w3_ref, b3_ref, o_ref):
    # x_ref: [8, tb] bf16 (batch on lanes). Weights in PyTorch (out, in) layout.
    # Layer 1 (+ folded b1): [64,8] @ [8,tb] on the MXU, f32 accumulation.
    h1 = jnp.dot(w1_ref[...], x_ref[...], preferred_element_type=jnp.float32)
    h1 = jnp.maximum(h1, 0.0).astype(jnp.bfloat16)

    # Layer 2: [64,64] @ [64,tb] on the MXU, bias add + ReLU on the VPU.
    h2 = jnp.dot(w2_ref[...], h1, preferred_element_type=jnp.float32)
    h2 = jnp.maximum(h2 + b2_ref[...], 0.0).astype(jnp.bfloat16)

    # Layer 3: [1,64] @ [64,tb] -> lane-dense [1, tb] output block.
    o = jnp.dot(w3_ref[...], h2, preferred_element_type=jnp.float32) + b3_ref[...]
    o_ref[...] = o.astype(o_ref.dtype)


def _round_up(n, m):
    return ((n + m - 1) // m) * m


def _choose_block_b(batch, max_block=8192):
    """Pick a batch tile: multiple of 128, large enough to amortize the ~0.35us
    per-grid-step overhead, capped for VMEM, and (for large B) giving >= 2 grid
    blocks so v7x megacore can shard the batch axis."""
    padded = _round_up(max(batch, 1), 128)
    if padded <= 512:
        return padded
    half = _round_up(pl.cdiv(padded, 2), 128)
    return min(max_block, half)


@functools.partial(jax.jit, static_argnums=(2,))
def _mlp_forward_impl(x, params, block_b):
    assert block_b % 128 == 0, "batch tile must be a multiple of 128 lanes"
    w1, b1, w2, b2, w3, b3 = params  # W: (out, in) like nn.Linear; b: (out, 1)
    B, d_in = x.shape
    assert d_in == D_IN

    n_blocks = pl.cdiv(B, block_b)
    b_pad = n_blocks * block_b

    # Cast to bf16 BEFORE the relayout (halves pad/transpose HBM bytes), put
    # batch on the lane dim, append the constant-1 bias row and two zero rows.
    # TODO(synk): if this MLP is the whole workload, produce x batch-last
    # upstream to remove this relayout pass entirely.
    x_bf = x.astype(jnp.bfloat16)
    x_aug = jnp.concatenate(
        [
            x_bf.T,                               # [5, B]
            jnp.ones((1, B), jnp.bfloat16),       # bias lane (folded b1)
            jnp.zeros((2, B), jnp.bfloat16),      # K pad 5 -> 8
        ],
        axis=0,
    )
    x_aug = jnp.pad(x_aug, ((0, 0), (0, b_pad - B)))  # [8, b_pad]

    # Fold b1 into an extra column of w1; feed the MXU bf16.
    w1_aug = jnp.concatenate(
        [w1, b1, jnp.zeros((D_H, D_IN_PAD - D_IN - 1), w1.dtype)], axis=1
    ).astype(jnp.bfloat16)                        # [64, 8]
    w2b = w2.astype(jnp.bfloat16)                 # [64, 64]
    w3b = w3.astype(jnp.bfloat16)                 # [1, 64]

    # Weights/biases: single resident block (index_map constant). Default
    # double-buffering of these costs < 200 KiB VMEM, so left at default.
    resident = lambda i: (0, 0)

    out_t = pl.pallas_call(
        _mlp_kernel,
        out_shape=jax.ShapeDtypeStruct((D_OUT, b_pad), jnp.float32),
        grid_spec=pl.GridSpec(
            grid=(n_blocks,),
            in_specs=[
                pl.BlockSpec((D_IN_PAD, block_b), lambda i: (0, i)),  # x tile
                pl.BlockSpec(w1_aug.shape, resident),
                pl.BlockSpec(w2b.shape, resident),
                pl.BlockSpec(b2.shape, resident),
                pl.BlockSpec(w3b.shape, resident),
                pl.BlockSpec(b3.shape, resident),
            ],
            out_specs=pl.BlockSpec((D_OUT, block_b), lambda i: (0, i)),
        ),
        compiler_params=pltpu.CompilerParams(
            dimension_semantics=("parallel",),
            vmem_limit_bytes=32 * 1024 * 1024,  # covers large tiles on v5e's 16 MiB default
        ),
    )(x_aug, w1_aug, w2b, b2, w3b, b3)

    return out_t[:, :B].T  # back to [B, 1]


def mlp_forward(x, params, *, block_b=None):
    """Fused MLP forward. x: [B, 5] float32 -> [B, 1] float32."""
    if block_b is None:
        block_b = _choose_block_b(x.shape[0])
    return _mlp_forward_impl(x, params, block_b)


def init_params(key):
    """Deterministic init matching nn.Linear (W: (out, in), b: (out, 1))."""
    k1, k2, k3, k4, k5, k6 = jax.random.split(key, 6)

    def lin(kw, kb, fan_in, fan_out):
        # PyTorch default: U(-1/sqrt(fan_in), 1/sqrt(fan_in))
        bound = 1.0 / jnp.sqrt(float(fan_in))
        w = jax.random.uniform(kw, (fan_out, fan_in), jnp.float32, -bound, bound)
        b = jax.random.uniform(kb, (fan_out, 1), jnp.float32, -bound, bound)
        return w, b

    w1, b1 = lin(k1, k2, D_IN, D_H)
    w2, b2 = lin(k3, k4, D_H, D_H)
    w3, b3 = lin(k5, k6, D_H, D_OUT)
    return (w1, b1, w2, b2, w3, b3)


def mlp_reference(x, params):
    w1, b1, w2, b2, w3, b3 = params
    h1 = jnp.maximum(x @ w1.T + b1.T, 0.0)
    h2 = jnp.maximum(h1 @ w2.T + b2.T, 0.0)
    return h2 @ w3.T + b3.T


if __name__ == "__main__":
    key = jax.random.PRNGKey(0)
    kx, kp = jax.random.split(key)

    # Small batch, deliberately not a multiple of 128 -> exercises padding and
    # the >=2-block grid path (block chooser gives block_b=384, 2 grid blocks).
    B = 700
    x = jax.random.normal(kx, (B, D_IN), dtype=jnp.float32)
    params = init_params(kp)

    out = mlp_forward(x, params)
    out = jax.block_until_ready(out)

    ref = mlp_reference(x, params)  # full-f32 reference
    assert out.shape == (B, 1)
    # bf16 MXU inputs with f32 accumulation -> loosened tolerance vs f32 reference.
    max_err = jnp.max(jnp.abs(out - ref))
    assert jnp.allclose(out, ref, atol=3e-2, rtol=3e-2), f"mismatch, max err {max_err}"

    print("KERNEL_OK")
</pallas_src>

<mosaic_0001>
module attributes {stable_mosaic.version = 11 : i64} {
  func.func @_mlp_kernel(%arg0: i32, %arg1: memref<8x384xbf16, #tpu.memory_space<vmem>>, %arg2: memref<64x8xbf16, #tpu.memory_space<vmem>>, %arg3: memref<64x64xbf16, #tpu.memory_space<vmem>>, %arg4: memref<64x1xf32, #tpu.memory_space<vmem>>, %arg5: memref<1x64xbf16, #tpu.memory_space<vmem>>, %arg6: memref<1x1xf32, #tpu.memory_space<vmem>>, %arg7: memref<1x384xf32, #tpu.memory_space<vmem>>) attributes {dimension_semantics = [#tpu.dimension_semantics<parallel>], iteration_bounds = array<i64: 2>, scalar_prefetch = 0 : i64, scratch_operands = 0 : i64, tpu.core_type = #tpu.core_type<tc>, window_params = [{transform_indices = @transform_0, window_bounds = array<i64: 8, 384>}, {pipeline_mode = #tpu.pipeline_mode<synchronous>, transform_indices = @transform_1, window_bounds = array<i64: 64, 8>}, {pipeline_mode = #tpu.pipeline_mode<synchronous>, transform_indices = @transform_2, window_bounds = array<i64: 64, 64>}, {pipeline_mode = #tpu.pipeline_mode<synchronous>, transform_indices = @transform_3, window_bounds = array<i64: 64, 1>}, {pipeline_mode = #tpu.pipeline_mode<synchronous>, transform_indices = @transform_4, window_bounds = array<i64: 1, 64>}, {pipeline_mode = #tpu.pipeline_mode<synchronous>, transform_indices = @transform_5, window_bounds = array<i64: 1, 1>}, {transform_indices = @transform_6, window_bounds = array<i64: 1, 384>}]} {
    %c0 = arith.constant 0 : index
    %c0_0 = arith.constant 0 : index
    %0 = vector.load %arg2[%c0, %c0_0] : memref<64x8xbf16, #tpu.memory_space<vmem>>, vector<64x8xbf16>
    %c0_1 = arith.constant 0 : index
    %c0_2 = arith.constant 0 : index
    %1 = vector.load %arg1[%c0_1, %c0_2] : memref<8x384xbf16, #tpu.memory_space<vmem>>, vector<8x384xbf16>
    %cst = arith.constant dense<0.000000e+00> : vector<64x384xf32>
    %2 = tpu.matmul %0, %1, %cst {dimension_numbers = #tpu.dot_dimension_numbers<[1], [0], [0], [1], [0, 0, 1, 1], [], []>} : vector<64x8xbf16>, vector<8x384xbf16>, vector<64x384xf32> -> vector<64x384xf32>
    %cst_3 = arith.constant 0.000000e+00 : f32
    %3 = vector.broadcast %cst_3 : f32 to vector<64x384xf32>
    %4 = arith.maximumf %2, %3 : vector<64x384xf32>
    %5 = arith.truncf %4 : vector<64x384xf32> to vector<64x384xbf16>
    %c0_4 = arith.constant 0 : index
    %c0_5 = arith.constant 0 : index
    %6 = vector.load %arg3[%c0_4, %c0_5] : memref<64x64xbf16, #tpu.memory_space<vmem>>, vector<64x64xbf16>
    %cst_6 = arith.constant dense<0.000000e+00> : vector<64x384xf32>
    %7 = tpu.matmul %6, %5, %cst_6 {dimension_numbers = #tpu.dot_dimension_numbers<[1], [0], [0], [1], [0, 0, 1, 1], [], []>} : vector<64x64xbf16>, vector<64x384xbf16>, vector<64x384xf32> -> vector<64x384xf32>
    %c0_7 = arith.constant 0 : index
    %c0_8 = arith.constant 0 : index
    %8 = vector.load %arg4[%c0_7, %c0_8] : memref<64x1xf32, #tpu.memory_space<vmem>>, vector<64x1xf32>
    %9 = vector.broadcast %8 : vector<64x1xf32> to vector<64x384xf32>
    %10 = arith.addf %7, %9 : vector<64x384xf32>
    %cst_9 = arith.constant 0.000000e+00 : f32
    %11 = vector.broadcast %cst_9 : f32 to vector<64x384xf32>
    %12 = arith.maximumf %10, %11 : vector<64x384xf32>
    %13 = arith.truncf %12 : vector<64x384xf32> to vector<64x384xbf16>
    %c0_10 = arith.constant 0 : index
    %c0_11 = arith.constant 0 : index
    %14 = vector.load %arg5[%c0_10, %c0_11] : memref<1x64xbf16, #tpu.memory_space<vmem>>, vector<1x64xbf16>
    %cst_12 = arith.constant dense<0.000000e+00> : vector<1x384xf32>
    %15 = tpu.matmul %14, %13, %cst_12 {dimension_numbers = #tpu.dot_dimension_numbers<[1], [0], [0], [1], [0, 0, 1, 1], [], []>} : vector<1x64xbf16>, vector<64x384xbf16>, vector<1x384xf32> -> vector<1x384xf32>
    %c0_13 = arith.constant 0 : index
    %c0_14 = arith.constant 0 : index
    %16 = vector.load %arg6[%c0_13, %c0_14] : memref<1x1xf32, #tpu.memory_space<vmem>>, vector<1x1xf32>
    %17 = vector.broadcast %16 : vector<1x1xf32> to vector<1x384xf32>
    %18 = arith.addf %15, %17 : vector<1x384xf32>
    %c0_15 = arith.constant 0 : index
    %c0_16 = arith.constant 0 : index
    %19 = vector.load %arg7[%c0_15, %c0_16] : memref<1x384xf32, #tpu.memory_space<vmem>>, vector<1x384xf32>
    tpu.vector_store %arg7[%c0_15, %c0_16], %18 {strides = array<i32>} : memref<1x384xf32, #tpu.memory_space<vmem>>, vector<1x384xf32>,
    return
  }
  func.func @transform_0(%arg0: i32) -> (i32, i32) {
    %c0_i32 = arith.constant 0 : i32
    %c0_i32_0 = arith.constant 0 : i32
    return %c0_i32, %arg0 : i32, i32
  }
  func.func @transform_1(%arg0: i32) -> (i32, i32) {
    %c0_i32 = arith.constant 0 : i32
    %c0_i32_0 = arith.constant 0 : i32
    %c0_i32_1 = arith.constant 0 : i32
    return %c0_i32, %c0_i32_0 : i32, i32
  }
  func.func @transform_2(%arg0: i32) -> (i32, i32) {
    %c0_i32 = arith.constant 0 : i32
    %c0_i32_0 = arith.constant 0 : i32
    %c0_i32_1 = arith.constant 0 : i32
    return %c0_i32, %c0_i32_0 : i32, i32
  }
  func.func @transform_3(%arg0: i32) -> (i32, i32) {
    %c0_i32 = arith.constant 0 : i32
    %c0_i32_0 = arith.constant 0 : i32
    %c0_i32_1 = arith.constant 0 : i32
    return %c0_i32, %c0_i32_0 : i32, i32
  }
  func.func @transform_4(%arg0: i32) -> (i32, i32) {
    %c0_i32 = arith.constant 0 : i32
    %c0_i32_0 = arith.constant 0 : i32
    %c0_i32_1 = arith.constant 0 : i32
    return %c0_i32, %c0_i32_0 : i32, i32
  }
  func.func @transform_5(%arg0: i32) -> (i32, i32) {
    %c0_i32 = arith.constant 0 : i32
    %c0_i32_0 = arith.constant 0 : i32
    %c0_i32_1 = arith.constant 0 : i32
    return %c0_i32, %c0_i32_0 : i32, i32
  }
  func.func @transform_6(%arg0: i32) -> (i32, i32) {
    %c0_i32 = arith.constant 0 : i32
    %c0_i32_0 = arith.constant 0 : i32
    return %c0_i32, %arg0 : i32, i32
  }
}

</mosaic_0001>

<bundles_post_ra>
// kernel: _mlp_forward_impl.1
= control target key start
LH: loop header
LB: loop body
LE: loop exit
PB: predicated region body
PF: predicated region fallthrough
CT: control target
= control target key end

     0   :  { %s1101_s23 = smov 0   ;;  %s1231_s0 = inlined_call_operand.vmem [shape: bf16[8,768], index: 0, kind: input, shape index: {}]   ;;  %s1232_s1 = inlined_call_operand.vmem [shape: bf16[64,8], index: 1, kind: input, shape index: {}]   ;;  %s1233_s2 = inlined_call_operand.vmem [shape: bf16[64,64], index: 2, kind: input, shape index: {}]   ;;  %s1234_s3 = inlined_call_operand.vmem [shape: f32[64,1], index: 3, kind: input, shape index: {}]   ;;  %s1235_s4 = inlined_call_operand.vmem [shape: bf16[1,64], index: 4, kind: input, shape index: {}]   ;;  %s1236_s5 = inlined_call_operand.<no memory space> [shape: f32[1,1], index: 5, kind: input, shape index: {}]   ;;  %s1237_s6 = inlined_call_operand.vmem [shape: f32[1,768], index: 6, kind: output, shape index: {}]  }
   0x1   :  { %v11_v0 = vstv %s1236_s5 }
   0x2   :  { %12 = vst [vmem:[#allocation2] sm:$0x1] %v11_v0 }
   0x3 LB: > { %s931_s24 = sadd.s32 4294967295, %s1057_s23   ;;  %p935_p0 = scmp.ge.s32.totalorder %s1057_s23, 1  ;;  %s1057_s23 = sphi %s1101_s23, %s18_s23  }
   0x4   : > { %p215_p1 = scmp.lt.s32.totalorder %s1057_s23, 3 }
   0x6   : > { %p216_p2 = pnand %p935_p0, %p215_p1 }
   0x7   : > { %s244_s25 = smul.u32 (!%p216_p2), 3, %s931_s24  ;;  %v1043_v1 = vld [vmem:[%s1232_s1] sm:$0xff] (!%p216_p2)   ;;  %v1059_v2 = vmov (!%p216_p2), 0   ;;  %vm294_vm0 = vcmask (!%p216_p2), 64512   ;;  %vm307_vm1 = vcmask (!%p216_p2), 1043456   ;;  %v1044_v8 = vld [vmem:[%s1232_s1 + $0x8] sm:$0xff] (!%p216_p2)  }
   0x8   : > { %219 = sbr.rel (%p216_p2) target bundleno = 745 (0x2e9), region = 44  ;;  %349 = vmatprep.mubr.bf16.mxu0 (!%p216_p2), %v1059_v2  ;;  %1038 = vset.pattern.permute.xlu0 (!%p216_p2), %v1059_v2  ;;  %v1045_v10 = vld [vmem:[%s1232_s1 + $0x10] sm:$0xff] (!%p216_p2)   ;;  %v1046_v11 = vld [vmem:[%s1232_s1 + $0x18] sm:$0xff] (!%p216_p2)   ;;  %v1145_v12 = vld [vmem:[%s1233_s2] sm:$0xff] (!%p216_p2)   ;;  %vm567_vm2 = vcmask (!%p216_p2), 523264   ;;  %vm1061_vm3 = vmmov (!%p216_p2), 0  }
   0x9   : > { %p245_p3 = scmp.lt.s32.totalorder (!%p216_p2), %s244_s25, 5  ;;  %989 = vmatprep.mubr.msk.bf16.mxu1 (!%p216_p2), %vm294_vm0, %v1043_v1  ;;  %1039 = vset.pattern.permute.xlu1 (!%p216_p2), %v1059_v2  ;;  %v499_v13 = vld [vmem:[%s1234_s3] sm:$0xff] (!%p216_p2)  ;;  %v501_v14 = vld [vmem:[%s1234_s3 + $0x10] sm:$0xff] (!%p216_p2)  ;;  %v500_v15 = vld [vmem:[%s1234_s3 + $0x8] sm:$0xff] (!%p216_p2) }
   0xa   : > { %509 = vperm.xlu0 (!%p216_p2), %1038, %v499_v13   ;;  %519 = vperm.xlu1 (!%p216_p2), %1039, %v501_v14   ;;  %v502_v16 = vld [vmem:[%s1234_s3 + $0x18] sm:$0xff] (!%p216_p2)  ;;  %v503_v17 = vld [vmem:[%s1234_s3 + $0x20] sm:$0xff] (!%p216_p2)  ;;  %v504_v18 = vld [vmem:[%s1234_s3 + $0x28] sm:$0xff] (!%p216_p2) }
   0xb   : > { %v505_v19 = vld [vmem:[%s1234_s3 + $0x30] sm:$0xff] (!%p216_p2)  ;;  %v506_v20 = vld [vmem:[%s1234_s3 + $0x38] sm:$0xff] (!%p216_p2)  ;;  %v755_v21 = vld [vmem:[#allocation2] sm:$0x1] (!%p216_p2) }
   0xe   : > { %514 = vperm.xlu0 (!%p216_p2), %1038, %v500_v15   ;;  %524 = vperm.xlu1 (!%p216_p2), %1039, %v502_v16  }
   0xf   : > { %s1239_s25 = smov (!%p245_p3, %s244_s25), 5 }
  0x10   : > { %s936_s5 = sshll.u32 %s1239_s25, 2  ;;  %s253_s18 = scalar_lea.vmem %s1237_s6, %s1239_s25 }
  0x11   : > { %s248_s30 = scalar_lea.vmem %s1231_s0, %s936_s5 }
  0x12   : > { %v264_v3 = vld [vmem:[%s248_s30] sm:$0xff]  ;;  %v1041_v4 = vld [vmem:[%s248_s30 + $0x8] ss:$0 sps:$4 sm:$0xff]   ;;  %529 = vperm.xlu0 %1038, %v503_v17   ;;  %534 = vperm.xlu1 %1039, %v504_v18   ;;  %v1050_v18 = vld [vmem:[%s1233_s2 + $0x18] sm:$0xff]  }
  0x13   : > { %v942_v5 = vcombine.high %v264_v3, %v264_v3  ;;  %v941_v6 = vcombine.low %v264_v3, %v264_v3  ;;  %1025 = vmatprep.subr.msk.bf16.mxu1 %vm307_vm1, %v1041_v4  ;;  %v315_v7 = vsel %vm307_vm1, %v1041_v4, 0 }
  0x14   : > { %988 = vmatpush3.bf16.msra.mxu1 %v315_v7 }
  0x15   : > { %944 = vmatprep.subr.msk.bf16.mxu0 %vm307_vm1, %v942_v5  ;;  %v309_v9 = vsel %vm307_vm1, %v941_v6, 0  ;;  %v1048_v5 = vld [vmem:[%s1233_s2 + $0x8] sm:$0xff]  }
  0x16   : > { %318 = vmatpush1.bf16.msra.mxu0 %v309_v9  ;;  %539 = vperm.xlu0 %1038, %v505_v19  }
  0x17   : > { %990 = vmatmul.mubr.msk.bf16.vlgmr.msra.gmra.mrb[0].mxu1 %vm294_vm0, %v1044_v8  ;;  %544 = vperm.xlu1 %1039, %v506_v20  }
  0x18   : > { %993 = vmatprep.mubr.msk.bf16.mxu1 %vm294_vm0, %v1045_v10 }
  0x19   : > { %945 = vmatmul.mubr.msk.bf16.vlgmr.msra.gmra.mrb[0].mxu0 %vm294_vm0, %v1043_v1 }
  0x1a   : > { %359 = vmatprep.mubr.bf16.mxu0 %v1059_v2  ;;  %758 = vperm.xlu0 %1038, %v755_v21  }
  0x1f   : > { %994 = vmatmul.mubr.msk.bf16.gmra.mrb[4].mxu1 %vm294_vm0, %v1046_v11 }
  0x20   : > { %612 = vmatprep.mubr.bf16.mxu1 %v1059_v2 }
  0x21   : > { %946 = vmatmul.mubr.msk.bf16.gmra.mrb[4].mxu0 %vm294_vm0, %v1044_v8  ;;  %v1049_v8 = vld [vmem:[%s1233_s2 + $0x10] sm:$0xff]  }
  0x22   : > { %369 = vmatprep.mubr.bf16.mxu0 %v1059_v2 }
  0x29   : > { %947 = vmatmul.mubr.msk.bf16.gmra.mrb[8].mxu0 %vm294_vm0, %v1045_v10 }
  0x2a   : > { %379 = vmatprep.mubr.bf16.mxu0 %v1059_v2 }
  0x31   : > { %948 = vmatmul.mubr.msk.bf16.gmra.mrb[12].mxu0 %vm294_vm0, %v1046_v11 }
  0x32   : > { %1005 = vmatprep.mubr.msk.bf16.mxu0 %vm567_vm2, %v1145_v12 }
  0xea   : > { %v991_v22 = vpop.f32.mrb[0].mxu1 }
  0xeb   : > { %v463_v24 = vmax.f32 %v991_v22, 0.0  ;;  %v424_v25 = vpop.f32.mrb[1].mxu1 }
  0xec   : > { %v351_v23 = vpop.f32.mrb[0].mxu0  ;;  %v457_v27 = vmax.f32 %v424_v25, 0.0  ;;  %v992_v28 = vpop.f32.mrb[2].mxu1 }
  0xed   : > { %v353_v26 = vpop.f32.mrb[1].mxu0  ;;  %v466_v30 = vmax.f32 %v992_v28, 0.0  ;;  %v427_v31 = vpop.f32.mrb[3].mxu1  ;;  %v455_v32 = vmax.f32 %v351_v23, 0.0  ;;  %v1060_v23 = vmov 0.0  }
  0xee   : > { %v355_v29 = vpop.f32.mrb[2].mxu0  ;;  %v460_v35 = vmax.f32 %v427_v31, 0.0  ;;  %v456_v36 = vmax.f32 %v353_v26, 0.0  ;;  %v520_v25 = vpop.permute.xlu1 %519 }
  0xef   : > { %v458_v33 = vmax.f32 %v355_v29, 0.0  ;;  %v357_v34 = vpop.f32.mrb[3].mxu0  ;;  %v484_v37 = vpack.c.bf16 %v466_v30, %v463_v24  ;;  %v510_v24 = vpop.permute.xlu0 %509 }
  0xf0   : > { %v459_v38 = vmax.f32 %v357_v34, 0.0  ;;  %v481_v40 = vpack.c.bf16 %v460_v35, %v457_v27 }
  0xf1   : > { %v479_v39 = vpack.c.bf16 %v458_v33, %v455_v32 }
  0xf2   : > { %v480_v41 = vpack.c.bf16 %v459_v38, %v456_v36  ;;  %v995_v42 = vpop.f32.mrb[4].mxu1  ;;  %997 = vmatprep.subr.bf16.mxu0 %v481_v40 }
  0xf3   : > { %v475_v44 = vmax.f32 %v995_v42, 0.0  ;;  %v440_v45 = vpop.f32.mrb[5].mxu1  ;;  %998 = vmatpush3.bf16.msra.mxu0 %v481_v40  ;;  %v515_v26 = vpop.permute.xlu0 %514 }
  0xf4   : > { %v361_v43 = vpop.f32.mrb[4].mxu0  ;;  %580 = vmatprep.subr.bf16.mxu1 %v480_v41  ;;  %v469_v47 = vmax.f32 %v440_v45, 0.0  ;;  %v996_v48 = vpop.f32.mrb[6].mxu1  ;;  %999 = vmatprep.subr.bf16.mxu0 %v484_v37 }
  0xf5   : > { %v363_v46 = vpop.f32.mrb[5].mxu0  ;;  %581 = vmatpush1.bf16.msra.mxu1 %v479_v39  ;;  %v478_v50 = vmax.f32 %v996_v48, 0.0  ;;  %v443_v51 = vpop.f32.mrb[7].mxu1  ;;  %v461_v52 = vmax.f32 %v361_v43, 0.0 }
  0xf6   : > { %v365_v49 = vpop.f32.mrb[6].mxu0  ;;  %v472_v55 = vmax.f32 %v443_v51, 0.0  ;;  %v462_v56 = vmax.f32 %v363_v46, 0.0 }
  0xf7   : > { %v464_v53 = vmax.f32 %v365_v49, 0.0  ;;  %v367_v54 = vpop.f32.mrb[7].mxu0  ;;  %v490_v57 = vpack.c.bf16 %v478_v50, %v475_v44  ;;  %1000 = vmatpush3.bf16.msra.mxu0 %v484_v37  ;;  %v1196_v28 = vpop.permute.xlu0 %529 }
  0xf8   : > { %v465_v58 = vmax.f32 %v367_v54, 0.0  ;;  %v487_v60 = vpack.c.bf16 %v472_v55, %v469_v47 }
  0xf9   : > { %v482_v59 = vpack.c.bf16 %v464_v53, %v461_v52 }
  0xfa   : > { %v483_v61 = vpack.c.bf16 %v465_v58, %v462_v56  ;;  %1001 = vmatprep.subr.bf16.mxu0 %v487_v60 }
  0xfb   : > { %1002 = vmatpush3.bf16.msra.mxu0 %v487_v60  ;;  %v1201_v40 = vpop.permute.xlu0 %539 }
  0xfc   : > { %v371_v62 = vpop.f32.mrb[8].mxu0  ;;  %582 = vmatprep.subr.bf16.mxu1 %v483_v61  ;;  %1003 = vmatprep.subr.bf16.mxu0 %v490_v57 }
  0xfd   : > { %v373_v63 = vpop.f32.mrb[9].mxu0  ;;  %583 = vmatpush1.bf16.msra.mxu1 %v482_v59  ;;  %v467_v1 = vmax.f32 %v371_v62, 0.0 }
  0xfe   : > { %v375_v0 = vpop.f32.mrb[10].mxu0  ;;  %v468_v6 = vmax.f32 %v373_v63, 0.0 }
  0xff   : > { %v470_v3 = vmax.f32 %v375_v0, 0.0  ;;  %v377_v4 = vpop.f32.mrb[11].mxu0  ;;  %1004 = vmatpush3.bf16.msra.mxu0 %v490_v57 }
 0x100   : > { %v471_v7 = vmax.f32 %v377_v4, 0.0 }
 0x101   : > { %v485_v9 = vpack.c.bf16 %v470_v3, %v467_v1 }
 0x102   : > { %v486_v10 = vpack.c.bf16 %v471_v7, %v468_v6  ;;  %1006 = vmatmul.mubr.msk.bf16.vlgmr.msra.gmra.mrb[16].mxu0 %vm567_vm2, %v1048_v5 }
 0x103   : > { %1009 = vmatprep.mubr.msk.bf16.mxu0 %vm567_vm2, %v1049_v8 }
 0x104   : > { %v381_v11 = vpop.f32.mrb[12].mxu0  ;;  %584 = vmatprep.subr.bf16.mxu1 %v486_v10 }
 0x105   : > { %v383_v13 = vpop.f32.mrb[13].mxu0  ;;  %585 = vmatpush1.bf16.msra.mxu1 %v485_v9  ;;  %v473_v15 = vmax.f32 %v381_v11, 0.0 }
 0x106   : > { %v385_v14 = vpop.f32.mrb[14].mxu0  ;;  %v474_v19 = vmax.f32 %v383_v13, 0.0  ;;  %v754_v13 = vld [vmem:[%s1235_s4] sm:$0x1] }
 0x107   : > { %v476_v16 = vmax.f32 %v385_v14, 0.0  ;;  %v387_v17 = vpop.f32.mrb[15].mxu0 }
 0x108   : > { %v477_v20 = vmax.f32 %v387_v17, 0.0 }
 0x109   : > { %v488_v21 = vpack.c.bf16 %v476_v16, %v473_v15 }
 0x10a   : > { %v489_v22 = vpack.c.bf16 %v477_v20, %v474_v19  ;;  %1010 = vmatmul.mubr.msk.bf16.gmra.mrb[20].mxu0 %vm567_vm2, %v1050_v18 }
 0x10b   : > { %800 = vmatprep.mubr.bf16.mxu0 %v1059_v2 }
 0x10c   : > { %586 = vmatprep.subr.bf16.mxu1 %v489_v22 }
 0x10d   : > { %587 = vmatpush1.bf16.msra.mxu1 %v488_v21 }
 0x10e   : > { %1013 = vmatprep.subr.bf16.mxu1 %v1060_v23 }
 0x110   : > { %957 = vmatmul.mubr.msk.bf16.vlgmr.msra.gmra.mrb[8].mxu1 %vm567_vm2, %v1145_v12  ;;  %v1194_v12 = vpop.permute.xlu1 %524 }
 0x111   : > { %622 = vmatprep.mubr.bf16.mxu1 %v1059_v2 }
 0x114   : > { %v1198_v33 = vpop.permute.xlu1 %534 }
 0x118   : > { %958 = vmatmul.mubr.msk.bf16.gmra.mrb[12].mxu1 %vm567_vm2, %v1048_v5  ;;  %v1203_v44 = vpop.permute.xlu1 %544 }
 0x119   : > { %632 = vmatprep.mubr.bf16.mxu1 %v1059_v2 }
 0x120   : > { %959 = vmatmul.mubr.msk.bf16.gmra.mrb[16].mxu1 %vm567_vm2, %v1049_v8 }
 0x121   : > { %642 = vmatprep.mubr.bf16.mxu1 %v1059_v2 }
 0x128   : > { %960 = vmatmul.mubr.msk.bf16.gmra.mrb[20].mxu1 %vm567_vm2, %v1050_v18 }
 0x129   : > { %1021 = vmatprep.mubr.msk.bf16.mxu1 %vm1061_vm3, %v1060_v23 }
 0x1d5   : > { %v1007_v27 = vpop.f32.mrb[16].mxu0 }
 0x1d6   : > { %v696_v29 = vadd.f32 %v1007_v27, %v520_v25  ;;  %v687_v30 = vpop.f32.mrb[17].mxu0 }
 0x1d7   : > { %v688_v31 = vadd.f32 %v687_v30, %v510_v24  ;;  %v1008_v32 = vpop.f32.mrb[18].mxu0 }
 0x1d8   : > { %v726_v2 = vmax.f32 %v696_v29, 0.0  ;;  %v699_v34 = vadd.f32 %v1008_v32, %v1194_v12  ;;  %v690_v35 = vpop.f32.mrb[19].mxu0 }
 0x1d9   : > { %v720_v36 = vmax.f32 %v688_v31, 0.0  ;;  %v691_v37 = vadd.f32 %v690_v35, %v515_v26 }
 0x1da   : > { %v729_v38 = vmax.f32 %v699_v34, 0.0 }
 0x1db   : > { %v723_v39 = vmax.f32 %v691_v37, 0.0 }
 0x1dc   : > { %v747_v41 = vpack.c.bf16 %v729_v38, %v726_v2 }
 0x1dd   : > { %v744_v42 = vpack.c.bf16 %v723_v39, %v720_v36  ;;  %v1011_v43 = vpop.f32.mrb[20].mxu0 }
 0x1de   : > { %v712_v45 = vadd.f32 %v1011_v43, %v1201_v40  ;;  %v703_v46 = vpop.f32.mrb[21].mxu0 }
 0x1df   : > { %v704_v47 = vadd.f32 %v703_v46, %v1196_v28  ;;  %v1012_v48 = vpop.f32.mrb[22].mxu0  ;;  %1014 = vmatpush3.bf16.msra.mxu1 %v744_v42 }
 0x1e0   : > { %v738_v49 = vmax.f32 %v712_v45, 0.0  ;;  %v715_v50 = vadd.f32 %v1012_v48, %v1203_v44  ;;  %v706_v51 = vpop.f32.mrb[23].mxu0  ;;  %1015 = vmatprep.subr.bf16.mxu1 %v1060_v23 }
 0x1e1   : > { %v732_v52 = vmax.f32 %v704_v47, 0.0  ;;  %v707_v53 = vadd.f32 %v706_v51, %v1198_v33 }
 0x1e2   : > { %v741_v54 = vmax.f32 %v715_v50, 0.0 }
 0x1e3   : > { %v614_v55 = vpop.f32.mrb[8].mxu1  ;;  %v735_v56 = vmax.f32 %v707_v53, 0.0  ;;  %1016 = vmatpush3.bf16.msra.mxu1 %v747_v41 }
 0x1e4   : > { %v615_v57 = vadd.f32 %v614_v55, %v510_v24  ;;  %v616_v58 = vpop.f32.mrb[9].mxu1  ;;  %v753_v59 = vpack.c.bf16 %v741_v54, %v738_v49  ;;  %1017 = vmatprep.subr.bf16.mxu1 %v1060_v23 }
 0x1e5   : > { %v617_v60 = vadd.f32 %v616_v58, %v510_v24  ;;  %v618_v61 = vpop.f32.mrb[10].mxu1  ;;  %v750_v62 = vpack.c.bf16 %v735_v56, %v732_v52  ;;  %v761_v56 = vlaneseq  ;;  %v1062_v58 = vmov 1966171168  }
 0x1e6   : > { %v619_v63 = vadd.f32 %v618_v61, %v515_v26  ;;  %v620_v0 = vpop.f32.mrb[11].mxu1  ;;  %v718_v3 = vmax.f32 %v615_v57, 0.0 }
 0x1e7   : > { %v621_v1 = vadd.f32 %v620_v0, %v515_v26  ;;  %1018 = vmatpush3.bf16.msra.mxu1 %v750_v62  ;;  %v719_v5 = vmax.f32 %v617_v60, 0.0  ;;  %v762_v57 = vshrl.u32 %v761_v56, 7  ;;  %vm878_vm4 = vcmp.lt.s32.totalorder %v761_v56, 384 }
 0x1e8   : > { %v721_v4 = vmax.f32 %v619_v63, 0.0  ;;  %1019 = vmatprep.subr.bf16.mxu1 %v1060_v23 }
 0x1e9   : > { %v722_v6 = vmax.f32 %v621_v1, 0.0  ;;  %v763_v60 = vsub.s32 0, %v762_v57 }
 0x1ea   : > { %v742_v7 = vpack.c.bf16 %v721_v4, %v718_v3 }
 0x1eb   : > { %v743_v8 = vpack.c.bf16 %v722_v6, %v719_v5  ;;  %v624_v9 = vpop.f32.mrb[12].mxu1  ;;  %1020 = vmatpush3.bf16.msra.mxu1 %v753_v59  ;;  %v854_v59 = vunpack.c.l.s4 %v1062_v58 }
 0x1ec   : > { %v625_v10 = vadd.f32 %v624_v9, %v520_v25  ;;  %v626_v11 = vpop.f32.mrb[13].mxu1 }
 0x1ed   : > { %v627_v14 = vadd.f32 %v626_v11, %v520_v25  ;;  %v628_v15 = vpop.f32.mrb[14].mxu1  ;;  %768 = vmatprep.subr.bf16.mxu0 %v743_v8  ;;  %v855_v61 = vunpack.c.0.s8 %v854_v59 }
 0x1ee   : > { %v629_v16 = vadd.f32 %v628_v15, %v1194_v12  ;;  %v630_v17 = vpop.f32.mrb[15].mxu1  ;;  %769 = vmatpush1.bf16.msra.mxu0 %v742_v7  ;;  %1022 = vmatmul.mubr.msk.bf16.vlgmr.msra.gmra.mrb[24].mxu1 %vm567_vm2, %v754_v13  ;;  %v724_v19 = vmax.f32 %v625_v10, 0.0 }
 0x1ef   : > { %v631_v18 = vadd.f32 %v630_v17, %v1194_v12  ;;  %v725_v21 = vmax.f32 %v627_v14, 0.0  ;;  %v858_v3 = vsub.s32 %v855_v61, %v762_v57 }
 0x1f0   : > { %v727_v20 = vmax.f32 %v629_v16, 0.0 }
 0x1f1   : > { %v728_v22 = vmax.f32 %v631_v18, 0.0 }
 0x1f2   : > { %v745_v23 = vpack.c.bf16 %v727_v20, %v724_v19 }
 0x1f3   : > { %v746_v24 = vpack.c.bf16 %v728_v22, %v725_v21  ;;  %v634_v26 = vpop.f32.mrb[16].mxu1 }
 0x1f4   : > { %v635_v27 = vadd.f32 %v634_v26, %v1196_v28  ;;  %v636_v25 = vpop.f32.mrb[17].mxu1 }
 0x1f5   : > { %v637_v29 = vadd.f32 %v636_v25, %v1196_v28  ;;  %v638_v30 = vpop.f32.mrb[18].mxu1  ;;  %770 = vmatprep.subr.bf16.mxu0 %v746_v24 }
 0x1f6   : > { %v639_v31 = vadd.f32 %v638_v30, %v1198_v33  ;;  %v640_v32 = vpop.f32.mrb[19].mxu1  ;;  %771 = vmatpush1.bf16.msra.mxu0 %v745_v23  ;;  %v730_v2 = vmax.f32 %v635_v27, 0.0 }
 0x1f7   : > { %v641_v12 = vadd.f32 %v640_v32, %v1198_v33  ;;  %v731_v35 = vmax.f32 %v637_v29, 0.0 }
 0x1f8   : > { %v733_v34 = vmax.f32 %v639_v31, 0.0 }
 0x1f9   : > { %v734_v36 = vmax.f32 %v641_v12, 0.0 }
 0x1fa   : > { %v748_v37 = vpack.c.bf16 %v733_v34, %v730_v2 }
 0x1fb   : > { %v749_v38 = vpack.c.bf16 %v734_v36, %v731_v35  ;;  %v644_v39 = vpop.f32.mrb[20].mxu1 }
 0x1fc   : > { %v645_v41 = vadd.f32 %v644_v39, %v1201_v40  ;;  %v646_v42 = vpop.f32.mrb[21].mxu1 }
 0x1fd   : > { %v647_v28 = vadd.f32 %v646_v42, %v1201_v40  ;;  %v648_v43 = vpop.f32.mrb[22].mxu1  ;;  %772 = vmatprep.subr.bf16.mxu0 %v749_v38 }
 0x1fe   : > { %v649_v45 = vadd.f32 %v648_v43, %v1203_v44  ;;  %v650_v46 = vpop.f32.mrb[23].mxu1  ;;  %773 = vmatpush1.bf16.msra.mxu0 %v748_v37  ;;  %v736_v47 = vmax.f32 %v645_v41, 0.0 }
 0x1ff   : > { %v651_v33 = vadd.f32 %v650_v46, %v1203_v44  ;;  %v737_v49 = vmax.f32 %v647_v28, 0.0  ;;  %v759_v44 = vpop.permute.xlu0 %758 }
 0x200   : > { %v739_v48 = vmax.f32 %v649_v45, 0.0  ;;  %v764_v62 = vrot.slane %v759_v44, %v763_v60 }
 0x201   : > { %v740_v50 = vmax.f32 %v651_v33, 0.0 }
 0x202   : > { %v751_v51 = vpack.c.bf16 %v739_v48, %v736_v47 }
 0x203   : > { %v752_v52 = vpack.c.bf16 %v740_v50, %v737_v49 }
 0x205   : > { %774 = vmatprep.subr.bf16.mxu0 %v752_v52 }
 0x206   : > { %775 = vmatpush1.bf16.msra.mxu0 %v751_v51 }
 0x209   : > { %965 = vmatmul.mubr.msk.bf16.vlgmr.msra.gmra.mrb[24].mxu0 %vm567_vm2, %v754_v13 }
 0x2c1   : > { %v843_v53 = vpop.f32.mrb[24].mxu1 }
 0x2c2   : > { %v1023_v40 = vpop.f32.mrb[25].mxu1  ;;  %v844_v4 = vadd.f32 %v843_v53, %v764_v62 }
 0x2c3   : > { %v846_v54 = vpop.f32.mrb[26].mxu1 }
 0x2c4   : > { %v1024_v55 = vpop.f32.mrb[27].mxu1  ;;  %v866_v9 = vrot.slane %v844_v4, %v858_v3 }
 0x2dc   : > { %v802_v63 = vpop.f32.mrb[24].mxu0 }
 0x2dd   : > { %v803_v0 = vadd.f32 %v802_v63, %v764_v62  ;;  %v804_v1 = vpop.f32.mrb[25].mxu0 }
 0x2de   : > { %v805_v5 = vadd.f32 %v804_v1, %v764_v62  ;;  %v806_v6 = vpop.f32.mrb[26].mxu0 }
 0x2df   : > { %v807_v7 = vpop.f32.mrb[27].mxu0 }
 0x2e0   : > { %v852_v8 = vcombine.low %v803_v0, %v805_v5 }
 0x2e2   : > { %v859_v10 = vrot.slane %v852_v8, %v858_v3 }
 0x2e4   : > { %v867_v11 = vcombine.low %v859_v10, %v866_v9 }
 0x2e6   : > { %v874_v13 = vrot.slane %v867_v11, %v858_v3 }
 0x2e8   : > { %880 = vst.msk [vmem:[%s253_s18] sm:$0x7] %vm878_vm4, %v874_v13 }
 0x2e9 PF: > { %s18_s23 = sadd.s32 1, %s1057_s23  }
 0x2ea   : > { %p15_p4 = scmp.ge.s32.totalorder %s18_s23, 4  }
 0x2ec   :  { %17 = sbr.rel (!%p15_p4) target bundleno = 3 (0x3), region = 74 }

</bundles_post_ra>
